<compile_context>
chip_gen: v7x
topology: tpu7x:2x2x1
jax: 0.10.0
libtpu: 0.0.40
codegen_flags: <defaults>
</compile_context>

<pallas_src>
import jax
import jax.numpy as jnp
from jax import lax
from jax.experimental import pallas as pl
from jax.experimental.pallas import tpu as pltpu


# ------------------------------- fused kernel ---------------------------------
def _fused_loss_kernel(c1_ref, v1_ref, c2_ref, v2_ref, o_ref):
    c1 = c1_ref[...].astype(jnp.float32)
    v1 = v1_ref[...].astype(jnp.float32)
    c2 = c2_ref[...].astype(jnp.float32)
    v2 = v2_ref[...].astype(jnp.float32)

    B, N, D = c1.shape
    Bc, C, _ = c2.shape
    M = Bc * C
    BN = B * N

    # --- L2-normalize the sim-self inputs in f32 (EUP rsqrt + one vmul) -------
    c1n = c1 * lax.rsqrt(jnp.sum(c1 * c1, axis=2, keepdims=True))
    v1n = v1 * lax.rsqrt(jnp.sum(v1 * v1, axis=2, keepdims=True))

    # --- ONE stacked matrix, ONE MXU push (bf16 operands, f32 accumulation) ---
    s = jnp.concatenate(
        [c1n.reshape(BN, D), v1n.reshape(BN, D),
         c2.reshape(M, D), v2.reshape(M, D)],
        axis=0,
    ).astype(jnp.bfloat16)                                    # (2BN + 2M, D)
    gram = lax.dot_general(s, s, (((1,), (1,)), ((), ())),
                           preferred_element_type=jnp.float32)  # (R, R) f32

    # --- SimSelfLoss terms: per-batch diagonal blocks of the shared gram ------
    rn = lax.broadcasted_iota(jnp.int32, (N, N), 0)
    cn = lax.broadcasted_iota(jnp.int32, (N, N), 1)
    off_diag = (rn != cn).astype(jnp.float32)[None]           # (1, N, N), hoisted
    inv_bm1 = jnp.float32(1.0 / (B - 1))                      # torch.std ddof=1
    scale = jnp.float32(25.0 / 16.0 * 100.0)

    def sim_self(offset):
        sim = jnp.stack(
            [gram[offset + b * N: offset + (b + 1) * N,
                  offset + b * N: offset + (b + 1) * N] for b in range(B)],
            axis=0) * off_diag                                 # (B, N, N)
        mean = jnp.mean(sim, axis=0)
        var = jnp.sum((sim - mean[None]) ** 2, axis=0) * inv_bm1
        return jnp.mean(jnp.sqrt(var)) * scale

    loss11 = sim_self(0)
    loss12 = sim_self(BN)

    # --- Contrastive terms: three logits blocks, one batched dual-CE pass -----
    o2 = 2 * BN          # start of current2 rows (multiple of 8)
    o3 = o2 + M          # start of voltage2 rows (multiple of 8)
    cc = gram[o2:o3, o2:o3]          # current2 @ current2^T
    cv = gram[o2:o3, o3:o3 + M]      # current2 @ voltage2^T
    vv = gram[o3:o3 + M, o3:o3 + M]  # voltage2 @ voltage2^T
    logits = jnp.stack([cv, cc, vv], axis=0)                  # (3, M, M)

    rm = lax.broadcasted_iota(jnp.int32, (M, M), 0)
    cm = lax.broadcasted_iota(jnp.int32, (M, M), 1)
    if C & (C - 1) == 0:                                      # power-of-two C
        lbl_r, lbl_c = rm & (C - 1), cm & (C - 1)
    else:
        lbl_r, lbl_c = rm % C, cm % C
    mask_r = (cm == lbl_r).astype(jnp.float32)[None]          # (1, M, M)
    mask_c = (rm == lbl_c).astype(jnp.float32)[None]          # (1, M, M)

    # Row-wise CE (labels one-hot along columns), batched over the 3 blocks.
    mx_r = jnp.max(logits, axis=2, keepdims=True)
    lse_r = jnp.log(jnp.sum(jnp.exp(logits - mx_r), axis=2, keepdims=True)) + mx_r
    ce_r = lse_r - jnp.sum(logits * mask_r, axis=2, keepdims=True)   # (3, M, 1)
    # Column-wise CE == CE(logits.T) with the same labels (no transpose built).
    mx_c = jnp.max(logits, axis=1, keepdims=True)
    lse_c = jnp.log(jnp.sum(jnp.exp(logits - mx_c), axis=1, keepdims=True)) + mx_c
    ce_c = lse_c - jnp.sum(logits * mask_c, axis=1, keepdims=True)   # (3, 1, M)

    half_inv_m = jnp.float32(0.5 / M)
    loss20 = (jnp.sum(ce_r[0]) + jnp.sum(ce_c[0])) * half_inv_m
    loss21 = (jnp.sum(ce_r[1]) + jnp.sum(ce_c[1])) * half_inv_m
    loss22 = (jnp.sum(ce_r[2]) + jnp.sum(ce_c[2])) * half_inv_m

    o_ref[0] = loss11
    o_ref[1] = loss12
    o_ref[2] = loss20
    o_ref[3] = loss21
    o_ref[4] = loss22


# -------------------------------- MyLossPlus ----------------------------------
@jax.jit
def my_loss_plus(current1, voltage1, current2, voltage2):
    B, N, D = current1.shape
    Bc, C, _ = current2.shape
    M = Bc * C
    R = 2 * B * N + 2 * M
    bytes_in = sum(int(a.size) * a.dtype.itemsize
                   for a in (current1, voltage1, current2, voltage2))
    cost = pl.CostEstimate(
        flops=2 * R * R * D,                       # one stacked gram
        transcendentals=6 * M * M + 2 * B * N,     # exp/log (rows+cols) + rsqrt
        bytes_accessed=bytes_in + 5 * 4,
    )
    out = pl.pallas_call(
        _fused_loss_kernel,
        out_shape=jax.ShapeDtypeStruct((5,), jnp.float32),
        in_specs=[
            pl.BlockSpec(memory_space=pltpu.VMEM),
            pl.BlockSpec(memory_space=pltpu.VMEM),
            pl.BlockSpec(memory_space=pltpu.VMEM),
            pl.BlockSpec(memory_space=pltpu.VMEM),
        ],
        out_specs=pl.BlockSpec(memory_space=pltpu.SMEM),
        cost_estimate=cost,
    )(current1, voltage1, current2, voltage2)
    return out[0], out[1], out[2], out[3], out[4]


# --------------------------- pure-JAX reference (check) -----------------------
def _ref_sim_self(sensor):
    xn = sensor / jnp.linalg.norm(sensor, axis=2, keepdims=True)
    sim = jnp.einsum("bnd,bmd->bnm", xn, xn)
    N = sim.shape[2]
    sim = sim * (1.0 - jnp.eye(N, dtype=sim.dtype))[None]
    std = jnp.std(sim, axis=0, ddof=1)
    return jnp.mean(std) * 25.0 / 16.0 * 100.0


def _ref_contrastive(current, voltage):
    B, C, D = current.shape
    a = current.reshape(B * C, D)
    b = voltage.reshape(B * C, D)
    logits = a @ b.T
    labels = jnp.tile(jnp.arange(C), B)

    def ce(lg):
        logp = jax.nn.log_softmax(lg, axis=1)
        return -jnp.mean(logp[jnp.arange(lg.shape[0]), labels])

    return (ce(logits) + ce(logits.T)) / 2.0


if __name__ == "__main__":
    key = jax.random.PRNGKey(0)
    k1, k2, k3, k4 = jax.random.split(key, 4)

    B, N, D = 2, 8, 32   # SimSelfLoss inputs: (batch, n_sensor, dim)
    C = 4                # ContrastiveLoss inputs: (batch, n_cmg, dim)

    current1 = jax.random.normal(k1, (B, N, D), dtype=jnp.float32)
    voltage1 = jax.random.normal(k2, (B, N, D), dtype=jnp.float32)
    current2 = jax.random.normal(k3, (B, C, D), dtype=jnp.float32)
    voltage2 = jax.random.normal(k4, (B, C, D), dtype=jnp.float32)

    losses = my_loss_plus(current1, voltage1, current2, voltage2)
    losses = jax.block_until_ready(losses)

    refs = (
        _ref_sim_self(current1),
        _ref_sim_self(voltage1),
        _ref_contrastive(current2, voltage2),
        _ref_contrastive(current2, current2),
        _ref_contrastive(voltage2, voltage2),
    )
    # Kernel uses bf16 MXU operands (f32 accumulation) per the perf review;
    # reference is pure f32, so the tolerance accounts for the bf16 cast.
    for got, want in zip(losses, refs):
        assert jnp.allclose(got, want, rtol=1e-2, atol=1e-2), (got, want)

    print("KERNEL_OK")
</pallas_src>

<mosaic_0001>
module attributes {stable_mosaic.version = 11 : i64} {
  func.func @_fused_loss_kernel(%arg0: memref<2x8x32xf32, #tpu.memory_space<vmem>>, %arg1: memref<2x8x32xf32, #tpu.memory_space<vmem>>, %arg2: memref<2x4x32xf32, #tpu.memory_space<vmem>>, %arg3: memref<2x4x32xf32, #tpu.memory_space<vmem>>, %arg4: memref<5xf32, #tpu.memory_space<smem>>) attributes {dimension_semantics = [], scalar_prefetch = 0 : i64, scratch_operands = 0 : i64, tpu.core_type = #tpu.core_type<tc>} {
    %c0 = arith.constant 0 : index
    %c0_0 = arith.constant 0 : index
    %c0_1 = arith.constant 0 : index
    %0 = vector.load %arg0[%c0, %c0_0, %c0_1] : memref<2x8x32xf32, #tpu.memory_space<vmem>>, vector<2x8x32xf32>
    %c0_2 = arith.constant 0 : index
    %c0_3 = arith.constant 0 : index
    %c0_4 = arith.constant 0 : index
    %1 = vector.load %arg1[%c0_2, %c0_3, %c0_4] : memref<2x8x32xf32, #tpu.memory_space<vmem>>, vector<2x8x32xf32>
    %c0_5 = arith.constant 0 : index
    %c0_6 = arith.constant 0 : index
    %c0_7 = arith.constant 0 : index
    %2 = vector.load %arg2[%c0_5, %c0_6, %c0_7] : memref<2x4x32xf32, #tpu.memory_space<vmem>>, vector<2x4x32xf32>
    %c0_8 = arith.constant 0 : index
    %c0_9 = arith.constant 0 : index
    %c0_10 = arith.constant 0 : index
    %3 = vector.load %arg3[%c0_8, %c0_9, %c0_10] : memref<2x4x32xf32, #tpu.memory_space<vmem>>, vector<2x4x32xf32>
    %4 = arith.mulf %0, %0 : vector<2x8x32xf32>
    %cst = arith.constant dense<0.000000e+00> : vector<2x8xf32>
    %5 = vector.multi_reduction <add>, %4, %cst [2] : vector<2x8x32xf32> to vector<2x8xf32>
    %6 = vector.shape_cast %5 : vector<2x8xf32> to vector<2x8x1xf32>
    %7 = math.rsqrt %6 : vector<2x8x1xf32>
    %8 = vector.broadcast %7 : vector<2x8x1xf32> to vector<2x8x32xf32>
    %9 = arith.mulf %0, %8 : vector<2x8x32xf32>
    %10 = arith.mulf %1, %1 : vector<2x8x32xf32>
    %cst_11 = arith.constant dense<0.000000e+00> : vector<2x8xf32>
    %11 = vector.multi_reduction <add>, %10, %cst_11 [2] : vector<2x8x32xf32> to vector<2x8xf32>
    %12 = vector.shape_cast %11 : vector<2x8xf32> to vector<2x8x1xf32>
    %13 = math.rsqrt %12 : vector<2x8x1xf32>
    %14 = vector.broadcast %13 : vector<2x8x1xf32> to vector<2x8x32xf32>
    %15 = arith.mulf %1, %14 : vector<2x8x32xf32>
    %16 = vector.shape_cast %9 : vector<2x8x32xf32> to vector<16x32xf32>
    %17 = vector.shape_cast %15 : vector<2x8x32xf32> to vector<16x32xf32>
    %18 = vector.shape_cast %2 : vector<2x4x32xf32> to vector<8x32xf32>
    %19 = vector.shape_cast %3 : vector<2x4x32xf32> to vector<8x32xf32>
    %20 = tpu.concatenate %16, %17, %18, %19 in 0 : vector<16x32xf32>, vector<16x32xf32>, vector<8x32xf32>, vector<8x32xf32> -> vector<48x32xf32>
    %21 = arith.truncf %20 : vector<48x32xf32> to vector<48x32xbf16>
    %cst_12 = arith.constant dense<0.000000e+00> : vector<48x48xf32>
    %22 = tpu.matmul %21, %21, %cst_12 {dimension_numbers = #tpu.dot_dimension_numbers<[1], [1], [0], [0], [0, 0, 1, 0], [], []>} : vector<48x32xbf16>, vector<48x32xbf16>, vector<48x48xf32> -> vector<48x48xf32>
    %23 = tpu.iota {dimensions = array<i32: 0>} : vector<8x8xi32>
    %24 = tpu.iota {dimensions = array<i32: 1>} : vector<8x8xi32>
    %25 = arith.cmpi ne, %23, %24 : vector<8x8xi32>
    %26 = arith.extui %25 : vector<8x8xi1> to vector<8x8xi32>
    %27 = arith.sitofp %26 : vector<8x8xi32> to vector<8x8xf32>
    %28 = vector.shape_cast %27 : vector<8x8xf32> to vector<1x8x8xf32>
    %29 = vector.extract_strided_slice %22 {offsets = [0, 0], sizes = [8, 8], strides = [1, 1]} : vector<48x48xf32> to vector<8x8xf32>
    %30 = vector.extract_strided_slice %22 {offsets = [8, 8], sizes = [8, 8], strides = [1, 1]} : vector<48x48xf32> to vector<8x8xf32>
    %31 = vector.shape_cast %29 : vector<8x8xf32> to vector<1x8x8xf32>
    %32 = vector.shape_cast %30 : vector<8x8xf32> to vector<1x8x8xf32>
    %33 = tpu.concatenate %31, %32 in 0 : vector<1x8x8xf32>, vector<1x8x8xf32> -> vector<2x8x8xf32>
    %34 = vector.broadcast %28 : vector<1x8x8xf32> to vector<2x8x8xf32>
    %35 = arith.mulf %33, %34 : vector<2x8x8xf32>
    %cst_13 = arith.constant dense<0.000000e+00> : vector<8x8xf32>
    %36 = vector.multi_reduction <add>, %35, %cst_13 [0] : vector<2x8x8xf32> to vector<8x8xf32>
    %cst_14 = arith.constant 2.000000e+00 : f32
    %37 = vector.broadcast %cst_14 : f32 to vector<8x8xf32>
    %38 = arith.divf %36, %37 : vector<8x8xf32>
    %39 = vector.shape_cast %38 : vector<8x8xf32> to vector<1x8x8xf32>
    %40 = vector.broadcast %39 : vector<1x8x8xf32> to vector<2x8x8xf32>
    %41 = arith.subf %35, %40 : vector<2x8x8xf32>
    %42 = arith.mulf %41, %41 : vector<2x8x8xf32>
    %cst_15 = arith.constant dense<0.000000e+00> : vector<8x8xf32>
    %43 = vector.multi_reduction <add>, %42, %cst_15 [0] : vector<2x8x8xf32> to vector<8x8xf32>
    %cst_16 = arith.constant 1.000000e+00 : f32
    %44 = vector.broadcast %cst_16 : f32 to vector<8x8xf32>
    %45 = arith.mulf %43, %44 : vector<8x8xf32>
    %46 = math.sqrt %45 : vector<8x8xf32>
    %47 = vector.shape_cast %46 : vector<8x8xf32> to vector<1x8x8xf32>
    %cst_17 = arith.constant dense<0.000000e+00> : vector<1xf32>
    %48 = vector.multi_reduction <add>, %47, %cst_17 [1, 2] : vector<1x8x8xf32> to vector<1xf32>
    %49 = vector.shape_cast %48 : vector<1xf32> to vector<1x1x1xf32>
    %50 = vector.extract %49[0, 0, 0] : f32 from vector<1x1x1xf32>
    %cst_18 = arith.constant 6.400000e+01 : f32
    %51 = arith.divf %50, %cst_18 : f32
    %cst_19 = arith.constant 1.562500e+02 : f32
    %52 = arith.mulf %51, %cst_19 : f32
    %53 = vector.extract_strided_slice %22 {offsets = [16, 16], sizes = [8, 8], strides = [1, 1]} : vector<48x48xf32> to vector<8x8xf32>
    %54 = vector.extract_strided_slice %22 {offsets = [24, 24], sizes = [8, 8], strides = [1, 1]} : vector<48x48xf32> to vector<8x8xf32>
    %55 = vector.shape_cast %53 : vector<8x8xf32> to vector<1x8x8xf32>
    %56 = vector.shape_cast %54 : vector<8x8xf32> to vector<1x8x8xf32>
    %57 = tpu.concatenate %55, %56 in 0 : vector<1x8x8xf32>, vector<1x8x8xf32> -> vector<2x8x8xf32>
    %58 = vector.broadcast %28 : vector<1x8x8xf32> to vector<2x8x8xf32>
    %59 = arith.mulf %57, %58 : vector<2x8x8xf32>
    %cst_20 = arith.constant dense<0.000000e+00> : vector<8x8xf32>
    %60 = vector.multi_reduction <add>, %59, %cst_20 [0] : vector<2x8x8xf32> to vector<8x8xf32>
    %cst_21 = arith.constant 2.000000e+00 : f32
    %61 = vector.broadcast %cst_21 : f32 to vector<8x8xf32>
    %62 = arith.divf %60, %61 : vector<8x8xf32>
    %63 = vector.shape_cast %62 : vector<8x8xf32> to vector<1x8x8xf32>
    %64 = vector.broadcast %63 : vector<1x8x8xf32> to vector<2x8x8xf32>
    %65 = arith.subf %59, %64 : vector<2x8x8xf32>
    %66 = arith.mulf %65, %65 : vector<2x8x8xf32>
    %cst_22 = arith.constant dense<0.000000e+00> : vector<8x8xf32>
    %67 = vector.multi_reduction <add>, %66, %cst_22 [0] : vector<2x8x8xf32> to vector<8x8xf32>
    %cst_23 = arith.constant 1.000000e+00 : f32
    %68 = vector.broadcast %cst_23 : f32 to vector<8x8xf32>
    %69 = arith.mulf %67, %68 : vector<8x8xf32>
    %70 = math.sqrt %69 : vector<8x8xf32>
    %71 = vector.shape_cast %70 : vector<8x8xf32> to vector<1x8x8xf32>
    %cst_24 = arith.constant dense<0.000000e+00> : vector<1xf32>
    %72 = vector.multi_reduction <add>, %71, %cst_24 [1, 2] : vector<1x8x8xf32> to vector<1xf32>
    %73 = vector.shape_cast %72 : vector<1xf32> to vector<1x1x1xf32>
    %74 = vector.extract %73[0, 0, 0] : f32 from vector<1x1x1xf32>
    %cst_25 = arith.constant 6.400000e+01 : f32
    %75 = arith.divf %74, %cst_25 : f32
    %cst_26 = arith.constant 1.562500e+02 : f32
    %76 = arith.mulf %75, %cst_26 : f32
    %77 = vector.extract_strided_slice %22 {offsets = [32, 32], sizes = [8, 8], strides = [1, 1]} : vector<48x48xf32> to vector<8x8xf32>
    %78 = vector.extract_strided_slice %22 {offsets = [32, 40], sizes = [8, 8], strides = [1, 1]} : vector<48x48xf32> to vector<8x8xf32>
    %79 = vector.extract_strided_slice %22 {offsets = [40, 40], sizes = [8, 8], strides = [1, 1]} : vector<48x48xf32> to vector<8x8xf32>
    %80 = vector.shape_cast %78 : vector<8x8xf32> to vector<1x8x8xf32>
    %81 = vector.shape_cast %77 : vector<8x8xf32> to vector<1x8x8xf32>
    %82 = vector.shape_cast %79 : vector<8x8xf32> to vector<1x8x8xf32>
    %83 = tpu.concatenate %80, %81, %82 in 0 : vector<1x8x8xf32>, vector<1x8x8xf32>, vector<1x8x8xf32> -> vector<3x8x8xf32>
    %84 = tpu.iota {dimensions = array<i32: 0>} : vector<8x8xi32>
    %85 = tpu.iota {dimensions = array<i32: 1>} : vector<8x8xi32>
    %c3_i32 = arith.constant 3 : i32
    %86 = vector.broadcast %c3_i32 : i32 to vector<8x8xi32>
    %87 = arith.andi %84, %86 : vector<8x8xi32>
    %c3_i32_27 = arith.constant 3 : i32
    %88 = vector.broadcast %c3_i32_27 : i32 to vector<8x8xi32>
    %89 = arith.andi %85, %88 : vector<8x8xi32>
    %90 = arith.cmpi eq, %85, %87 : vector<8x8xi32>
    %91 = arith.extui %90 : vector<8x8xi1> to vector<8x8xi32>
    %92 = arith.sitofp %91 : vector<8x8xi32> to vector<8x8xf32>
    %93 = vector.shape_cast %92 : vector<8x8xf32> to vector<1x8x8xf32>
    %94 = arith.cmpi eq, %84, %89 : vector<8x8xi32>
    %95 = arith.extui %94 : vector<8x8xi1> to vector<8x8xi32>
    %96 = arith.sitofp %95 : vector<8x8xi32> to vector<8x8xf32>
    %97 = vector.shape_cast %96 : vector<8x8xf32> to vector<1x8x8xf32>
    %cst_28 = arith.constant dense<0xFF800000> : vector<3x8xf32>
    %98 = vector.multi_reduction <maximumf>, %83, %cst_28 [2] : vector<3x8x8xf32> to vector<3x8xf32>
    %99 = vector.shape_cast %98 : vector<3x8xf32> to vector<3x8x1xf32>
    %100 = vector.broadcast %99 : vector<3x8x1xf32> to vector<3x8x8xf32>
    %101 = arith.subf %83, %100 : vector<3x8x8xf32>
    %102 = math.exp %101 : vector<3x8x8xf32>
    %cst_29 = arith.constant dense<0.000000e+00> : vector<3x8xf32>
    %103 = vector.multi_reduction <add>, %102, %cst_29 [2] : vector<3x8x8xf32> to vector<3x8xf32>
    %104 = vector.shape_cast %103 : vector<3x8xf32> to vector<3x8x1xf32>
    %105 = math.log %104 : vector<3x8x1xf32>
    %106 = arith.addf %105, %99 : vector<3x8x1xf32>
    %107 = vector.broadcast %93 : vector<1x8x8xf32> to vector<3x8x8xf32>
    %108 = arith.mulf %83, %107 : vector<3x8x8xf32>
    %cst_30 = arith.constant dense<0.000000e+00> : vector<3x8xf32>
    %109 = vector.multi_reduction <add>, %108, %cst_30 [2] : vector<3x8x8xf32> to vector<3x8xf32>
    %110 = vector.shape_cast %109 : vector<3x8xf32> to vector<3x8x1xf32>
    %111 = arith.subf %106, %110 : vector<3x8x1xf32>
    %cst_31 = arith.constant dense<0xFF800000> : vector<3x8xf32>
    %112 = vector.multi_reduction <maximumf>, %83, %cst_31 [1] : vector<3x8x8xf32> to vector<3x8xf32>
    %113 = vector.shape_cast %112 : vector<3x8xf32> to vector<3x1x8xf32>
    %114 = vector.broadcast %113 : vector<3x1x8xf32> to vector<3x8x8xf32>
    %115 = arith.subf %83, %114 : vector<3x8x8xf32>
    %116 = math.exp %115 : vector<3x8x8xf32>
    %cst_32 = arith.constant dense<0.000000e+00> : vector<3x8xf32>
    %117 = vector.multi_reduction <add>, %116, %cst_32 [1] : vector<3x8x8xf32> to vector<3x8xf32>
    %118 = vector.shape_cast %117 : vector<3x8xf32> to vector<3x1x8xf32>
    %119 = math.log %118 : vector<3x1x8xf32>
    %120 = arith.addf %119, %113 : vector<3x1x8xf32>
    %121 = vector.broadcast %97 : vector<1x8x8xf32> to vector<3x8x8xf32>
    %122 = arith.mulf %83, %121 : vector<3x8x8xf32>
    %cst_33 = arith.constant dense<0.000000e+00> : vector<3x8xf32>
    %123 = vector.multi_reduction <add>, %122, %cst_33 [1] : vector<3x8x8xf32> to vector<3x8xf32>
    %124 = vector.shape_cast %123 : vector<3x8xf32> to vector<3x1x8xf32>
    %125 = arith.subf %120, %124 : vector<3x1x8xf32>
    %126 = vector.extract_strided_slice %111 {offsets = [0, 0, 0], sizes = [1, 8, 1], strides = [1, 1, 1]} : vector<3x8x1xf32> to vector<1x8x1xf32>
    %127 = vector.shape_cast %126 : vector<1x8x1xf32> to vector<8x1xf32>
    %128 = vector.shape_cast %127 : vector<8x1xf32> to vector<1x8x1xf32>
    %cst_34 = arith.constant dense<0.000000e+00> : vector<1xf32>
    %129 = vector.multi_reduction <add>, %128, %cst_34 [1, 2] : vector<1x8x1xf32> to vector<1xf32>
    %130 = vector.shape_cast %129 : vector<1xf32> to vector<1x1x1xf32>
    %131 = vector.extract %130[0, 0, 0] : f32 from vector<1x1x1xf32>
    %132 = vector.extract_strided_slice %125 {offsets = [0, 0, 0], sizes = [1, 1, 8], strides = [1, 1, 1]} : vector<3x1x8xf32> to vector<1x1x8xf32>
    %133 = vector.shape_cast %132 : vector<1x1x8xf32> to vector<1x8xf32>
    %134 = vector.shape_cast %133 : vector<1x8xf32> to vector<1x1x8xf32>
    %cst_35 = arith.constant dense<0.000000e+00> : vector<1xf32>
    %135 = vector.multi_reduction <add>, %134, %cst_35 [1, 2] : vector<1x1x8xf32> to vector<1xf32>
    %136 = vector.shape_cast %135 : vector<1xf32> to vector<1x1x1xf32>
    %137 = vector.extract %136[0, 0, 0] : f32 from vector<1x1x1xf32>
    %138 = arith.addf %131, %137 : f32
    %cst_36 = arith.constant 6.250000e-02 : f32
    %139 = arith.mulf %138, %cst_36 : f32
    %140 = vector.extract_strided_slice %111 {offsets = [1, 0, 0], sizes = [1, 8, 1], strides = [1, 1, 1]} : vector<3x8x1xf32> to vector<1x8x1xf32>
    %141 = vector.shape_cast %140 : vector<1x8x1xf32> to vector<8x1xf32>
    %142 = vector.shape_cast %141 : vector<8x1xf32> to vector<1x8x1xf32>
    %cst_37 = arith.constant dense<0.000000e+00> : vector<1xf32>
    %143 = vector.multi_reduction <add>, %142, %cst_37 [1, 2] : vector<1x8x1xf32> to vector<1xf32>
    %144 = vector.shape_cast %143 : vector<1xf32> to vector<1x1x1xf32>
    %145 = vector.extract %144[0, 0, 0] : f32 from vector<1x1x1xf32>
    %146 = vector.extract_strided_slice %125 {offsets = [1, 0, 0], sizes = [1, 1, 8], strides = [1, 1, 1]} : vector<3x1x8xf32> to vector<1x1x8xf32>
    %147 = vector.shape_cast %146 : vector<1x1x8xf32> to vector<1x8xf32>
    %148 = vector.shape_cast %147 : vector<1x8xf32> to vector<1x1x8xf32>
    %cst_38 = arith.constant dense<0.000000e+00> : vector<1xf32>
    %149 = vector.multi_reduction <add>, %148, %cst_38 [1, 2] : vector<1x1x8xf32> to vector<1xf32>
    %150 = vector.shape_cast %149 : vector<1xf32> to vector<1x1x1xf32>
    %151 = vector.extract %150[0, 0, 0] : f32 from vector<1x1x1xf32>
    %152 = arith.addf %145, %151 : f32
    %cst_39 = arith.constant 6.250000e-02 : f32
    %153 = arith.mulf %152, %cst_39 : f32
    %154 = vector.extract_strided_slice %111 {offsets = [2, 0, 0], sizes = [1, 8, 1], strides = [1, 1, 1]} : vector<3x8x1xf32> to vector<1x8x1xf32>
    %155 = vector.shape_cast %154 : vector<1x8x1xf32> to vector<8x1xf32>
    %156 = vector.shape_cast %155 : vector<8x1xf32> to vector<1x8x1xf32>
    %cst_40 = arith.constant dense<0.000000e+00> : vector<1xf32>
    %157 = vector.multi_reduction <add>, %156, %cst_40 [1, 2] : vector<1x8x1xf32> to vector<1xf32>
    %158 = vector.shape_cast %157 : vector<1xf32> to vector<1x1x1xf32>
    %159 = vector.extract %158[0, 0, 0] : f32 from vector<1x1x1xf32>
    %160 = vector.extract_strided_slice %125 {offsets = [2, 0, 0], sizes = [1, 1, 8], strides = [1, 1, 1]} : vector<3x1x8xf32> to vector<1x1x8xf32>
    %161 = vector.shape_cast %160 : vector<1x1x8xf32> to vector<1x8xf32>
    %162 = vector.shape_cast %161 : vector<1x8xf32> to vector<1x1x8xf32>
    %cst_41 = arith.constant dense<0.000000e+00> : vector<1xf32>
    %163 = vector.multi_reduction <add>, %162, %cst_41 [1, 2] : vector<1x1x8xf32> to vector<1xf32>
    %164 = vector.shape_cast %163 : vector<1xf32> to vector<1x1x1xf32>
    %165 = vector.extract %164[0, 0, 0] : f32 from vector<1x1x1xf32>
    %166 = arith.addf %159, %165 : f32
    %cst_42 = arith.constant 6.250000e-02 : f32
    %167 = arith.mulf %166, %cst_42 : f32
    %c0_43 = arith.constant 0 : index
    %168 = memref.load %arg4[%c0_43] : memref<5xf32, #tpu.memory_space<smem>>
    memref.store %52, %arg4[%c0_43] : memref<5xf32, #tpu.memory_space<smem>>
    %c1 = arith.constant 1 : index
    %169 = memref.load %arg4[%c1] : memref<5xf32, #tpu.memory_space<smem>>
    memref.store %76, %arg4[%c1] : memref<5xf32, #tpu.memory_space<smem>>
    %c2 = arith.constant 2 : index
    %170 = memref.load %arg4[%c2] : memref<5xf32, #tpu.memory_space<smem>>
    memref.store %139, %arg4[%c2] : memref<5xf32, #tpu.memory_space<smem>>
    %c3 = arith.constant 3 : index
    %171 = memref.load %arg4[%c3] : memref<5xf32, #tpu.memory_space<smem>>
    memref.store %153, %arg4[%c3] : memref<5xf32, #tpu.memory_space<smem>>
    %c4 = arith.constant 4 : index
    %172 = memref.load %arg4[%c4] : memref<5xf32, #tpu.memory_space<smem>>
    memref.store %167, %arg4[%c4] : memref<5xf32, #tpu.memory_space<smem>>
    return
  }
}

</mosaic_0001>

<bundles_post_ra>
// kernel: my_loss_plus.1
= control target key start
LH: loop header
LB: loop body
LE: loop exit
PB: predicated region body
PF: predicated region fallthrough
CT: control target
= control target key end

     0   :  { %9 = vsyncpa [#allocation3], 0  ;;  %s958_s0 = inlined_call_operand.hbm [shape: f32[2,8,32], index: 0, kind: input, shape index: {}]   ;;  %s959_s1 = inlined_call_operand.hbm [shape: f32[2,8,32], index: 1, kind: input, shape index: {}]   ;;  %s960_s2 = inlined_call_operand.hbm [shape: f32[2,4,32], index: 2, kind: input, shape index: {}]   ;;  %s961_s3 = inlined_call_operand.vmem [shape: f32[2,4,32], index: 3, kind: input, shape index: {}]   ;;  %s962_s4 = inlined_call_operand.vmem [shape: f32[5], index: 4, kind: output, shape index: {}]  }
   0x1   :  { %10 = vsyncpa [#allocation6], 0 }
   0x2   :  { %11 = vsyncpa [#allocation4], 0  ;;  %s740_s15 = smov [#allocation5]   ;;  %s741_s17 = smov [#allocation2]  }
   0x3   :  { %s29_s16 = sshll.u32 %s740_s15, 4  ;;  %s17_s18 = sshll.u32 %s741_s17, 4  ;;  %s30_s16 = int_to_ptr.vmem [resolvable:$true] %s29_s16  ;;  %s780_s18 = int_to_ptr.vmem [resolvable:$true] %s17_s18 }
   0x4   :  { %s656_s21 = scalar_lea.hbm %s959_s1, 256 }
   0x5   :  { %p657_p0 = scmp.ne.s32.totalorder %s959_s1, %s656_s21  ;;  %p660_p1 = scmp.lt.u32.totalorder %s656_s21, %s959_s1 }
   0x7   :  { %p662_p2 = pnand %p660_p1, %p657_p0 }
   0x9   :  { %665 = shalt.err (!%p662_p2)
}
   0xa   :  { %s666_s26 = scalar_lea.vmem %s30_s16, 256  ;;  %p671_p4 = scmp.lt.s32.totalorder %s30_s16, %s30_s16 }
   0xb   :  { %p667_p3 = scmp.ne.s32.totalorder %s30_s16, %s666_s26  ;;  %p672_p5 = scmp.lt.s32.totalorder %s666_s26, %s666_s26 }
   0xd   :  { %p673_p6 = por %p672_p5, %p671_p4 }
   0xf   :  { %p674_p7 = pnand %p673_p6, %p667_p3 }
  0x11   :  { %677 = shalt.err (!%p674_p7)
}
  0x12   :  { %s742_s27 = smov 128   ;;  %s743_s28 = smov 8  }
  0x13   :  { %35 = dma.hbm_to_vmem [thread:$0]  %s959_s1, 256, %s30_s16, [#allocation6], %s742_s27, %s742_s27, %s743_s28  }
  0x14   :  { %s678_s7 = scalar_lea.hbm %s958_s0, 256 }
  0x15   :  { %p679_p8 = scmp.ne.s32.totalorder %s958_s0, %s678_s7  ;;  %p682_p9 = scmp.lt.u32.totalorder %s678_s7, %s958_s0 }
  0x17   :  { %p684_p10 = pnand %p682_p9, %p679_p8 }
  0x19   :  { %687 = shalt.err (!%p684_p10)
}
  0x1a   :  { %s688_s12 = scalar_lea.vmem %s780_s18, 256  ;;  %p693_p12 = scmp.lt.s32.totalorder %s780_s18, %s780_s18 }
  0x1b   :  { %p689_p11 = scmp.ne.s32.totalorder %s780_s18, %s688_s12  ;;  %p694_p13 = scmp.lt.s32.totalorder %s688_s12, %s688_s12 }
  0x1d   :  { %p695_p0 = por %p694_p13, %p693_p12 }
  0x1f   :  { %p696_p1 = pnand %p695_p0, %p689_p11 }
  0x21   :  { %699 = shalt.err (!%p696_p1)
}
  0x22   :  { %23 = dma.hbm_to_vmem [thread:$0]  %s958_s0, 256, %s780_s18, [#allocation3], %s742_s27, %s742_s27, %s743_s28  }
  0x23   :  { %s744_s14 = smov [#allocation7]   ;;  %s700_s19 = scalar_lea.hbm %s960_s2, 128 }
  0x24   :  { %s41_s15 = sshll.u32 %s744_s14, 4  ;;  %p701_p2 = scmp.ne.s32.totalorder %s960_s2, %s700_s19  ;;  %s42_s15 = int_to_ptr.vmem [resolvable:$true] %s41_s15 }
  0x25   :  { %p704_p3 = scmp.lt.u32.totalorder %s700_s19, %s960_s2 }
  0x27   :  { %p706_p4 = pnand %p704_p3, %p701_p2 }
  0x29   :  { %709 = shalt.err (!%p706_p4)
}
  0x2a   :  { %s710_s24 = scalar_lea.vmem %s42_s15, 128  ;;  %p715_p6 = scmp.lt.s32.totalorder %s42_s15, %s42_s15 }
  0x2b   :  { %p711_p5 = scmp.ne.s32.totalorder %s42_s15, %s710_s24  ;;  %p716_p7 = scmp.lt.s32.totalorder %s710_s24, %s710_s24 }
  0x2d   :  { %p717_p8 = por %p716_p7, %p715_p6 }
  0x2f   :  { %p718_p9 = pnand %p717_p8, %p711_p5 }
  0x31   :  { %721 = shalt.err (!%p718_p9)
}
  0x32   :  { %s745_s0 = smov 64   ;;  %s746_s18 = smov 4  }
  0x33   :  { %47 = dma.hbm_to_vmem [thread:$0]  %s960_s2, 128, %s42_s15, [#allocation6], %s745_s0, %s745_s0, %s746_s18  }
  0x34   :  { %734 = dma.done.wait [#allocation3], 256  }
  0x35   :  { %735 = vsyncadd [#allocation3], 4294967040 }
  0x36   :  { %736 = dma.done.wait [#allocation6], 384  }
  0x37   :  { %737 = vsyncadd [#allocation6], 4294966912  ;;  %v60_v0 = vld [vmem:[#allocation2] sm:$0xff]  ;;  %vm70_vm0 = vcmask 261120   ;;  %v62_v1 = vld [vmem:[#allocation5] sm:$0xff]  ;;  %v747_v12 = vmov 0.0  }
  0x38   :  { %v61_v2 = vld [vmem:[#allocation2 + $0x8] sm:$0xff]  ;;  %v68_v3 = vmul.f32 %v60_v0, %v60_v0  ;;  %v81_v4 = vmul.f32 %v62_v1, %v62_v1  ;;  %v63_v6 = vld [vmem:[#allocation5 + $0x8] sm:$0xff]  ;;  %563 = vmatprep.subr.bf16.mxu0 %v747_v12  ;;  %581 = vmatprep.subr.bf16.mxu1 %v747_v12  ;;  %vm748_vm1 = vmmov 0   ;;  %v618_v28 = vld [vmem:[#allocation7] sm:$0xff]   ;;  %vm276_vm2 = vcmask 392512   ;;  %s751_s29 = smov 120  }
  0x39   :  { %v69_v5 = vmul.f32 %v61_v2, %v61_v2  ;;  %v82_v7 = vmul.f32 %v63_v6, %v63_v6  ;;  %569 = vmatprep.mubr.msk.bf16.mxu0 %vm748_vm1, %v747_v12  ;;  %573 = vmatprep.mubr.msk.bf16.mxu1 %vm748_vm1, %v747_v12  ;;  %v619_v29 = vld [vmem:[%s961_s3] sm:$0xff]   ;;  %s749_s3 = smov 40   ;;  %s752_s30 = smov 16   ;;  %vm183_vm6 = vcmask 64512   ;;  %vm227_vm7 = vcmask 195712  }
  0x3a   :  { %v71_v8 = vsel %vm70_vm0, %v68_v3, 0.0  ;;  %v83_v9 = vsel %vm70_vm0, %v81_v4, 0.0  ;;  %v103_v31 = vpack.c.bf16 %v619_v29, %v618_v28  ;;  %v170_v4 = vlaneseq  ;;  %s753_s5 = smov 112   ;;  %s540_s24 = sshll.u32 %s962_s4, 4  ;;  %s541_s24 = int_to_ptr.vmem [resolvable:$true] %s540_s24 }
  0x3b   :  { %72 = vadd.xlane.f32.xlu0 %v71_v8  ;;  %84 = vadd.xlane.f32.xlu1 %v83_v9  ;;  %v74_v10 = vsel %vm70_vm0, %v69_v5, 0.0  ;;  %v86_v11 = vsel %vm70_vm0, %v82_v7, 0.0  ;;  %vm459_vm12 = vcmask 57344   ;;  %vm444_vm13 = vcmask 7168   ;;  %s722_s25 = scalar_lea.vmem %s541_s24, 16  ;;  %p727_p11 = scmp.lt.s32.totalorder %s541_s24, %s541_s24 }
  0x3c   :  { %v111_v32 = vsel %vm70_vm0, %v103_v31, 0  ;;  %v171_v5 = vshrl.u32 %v170_v4, 7  ;;  %v173_v7 = vand.u32 127, %v170_v4  ;;  %p723_p10 = scmp.ne.s32.totalorder %s541_s24, %s722_s25  ;;  %p728_p12 = scmp.lt.s32.totalorder %s722_s25, %s722_s25 }
  0x3e   :  { %vm174_vm4 = vcmp.ne.s32.totalorder %v171_v5, %v173_v7  ;;  %p729_p13 = por %p728_p12, %p727_p11 }
  0x3f   :  { %75 = vadd.xlane.f32.xlu0 %v74_v10  ;;  %87 = vadd.xlane.f32.xlu1 %v86_v11 }
  0x40   :  { %p730_p0 = pnand %p729_p13, %p723_p10 }
  0xc8   :  { %v73_v13 = vpop.xlane.xlu0 %72  ;;  %v85_v14 = vpop.xlane.xlu1 %84 }
  0xc9   :  { %620 = vrsqrt.f32 %v73_v13 }
  0xcc   :  { %v76_v15 = vpop.xlane.xlu0 %75  ;;  %v88_v16 = vpop.xlane.xlu1 %87 }
  0xcd   :  { %622 = vrsqrt.f32 %v76_v15 }
  0xce   :  { %624 = vrsqrt.f32 %v85_v14 }
  0xcf   :  { %626 = vrsqrt.f32 %v88_v16 }
  0xd3   :  { %v621_v17 = vpop.eup %620 }
  0xd4   :  { %v79_v20 = vmul.f32 %v621_v17, %v60_v0 }
  0xd7   :  { %v623_v18 = vpop.eup %622 }
  0xd8   :  { %v625_v19 = vpop.eup %624  ;;  %v80_v21 = vmul.f32 %v623_v18, %v61_v2 }
  0xd9   :  { %v627_v22 = vpop.eup %626  ;;  %v91_v25 = vmul.f32 %v625_v19, %v62_v1 }
  0xda   :  { %v101_v23 = vpack.c.bf16 %v80_v21, %v79_v20  ;;  %v92_v26 = vmul.f32 %v627_v22, %v63_v6  ;;  %v268_v6 = vand.u32 3, %v171_v5 }
  0xdc   :  { %v105_v24 = vsel %vm70_vm0, %v101_v23, 0  ;;  %v102_v27 = vpack.c.bf16 %v92_v26, %v91_v25  ;;  %vm270_vm3 = vcmp.eq.s32.totalorder %v173_v7, %v268_v6  ;;  %v896_v25 = vsel %vm174_vm4, 1.0, %v747_v12 }
  0xdd   :  { %564 = vmatpush3.bf16.xpose.msra.mxu0 %v105_v24  ;;  %584 = vmatpush3.bf16.xpose.msra.mxu1 %v105_v24  ;;  %v555_v8 = vsel %vm270_vm3, 1.0, %v747_v12  ;;  %v269_v24 = vand.u32 3, %v173_v7 }
  0xde   :  { %565 = vmatprep.subr.bf16.mxu0 %v747_v12  ;;  %582 = vmatprep.subr.bf16.mxu1 %v747_v12  ;;  %v108_v30 = vsel %vm70_vm0, %v102_v27, 0 }
  0xdf   :  { %vm273_vm5 = vcmp.eq.s32.totalorder %v171_v5, %v269_v24 }
  0xe0   :  { %v556_v28 = vsel %vm273_vm5, 1.0, %v747_v12 }
  0xe5   :  { %566 = vmatpush3.bf16.xpose.msra.mxu0 %v108_v30  ;;  %585 = vmatpush3.bf16.xpose.msra.mxu1 %v108_v30 }
  0xe6   :  { %567 = vmatprep.subr.bf16.mxu0 %v747_v12  ;;  %583 = vmatprep.subr.bf16.mxu1 %v747_v12 }
  0xed   :  { %568 = vmatpush3.bf16.xpose.msra.mxu0 %v111_v32  ;;  %586 = vmatpush3.bf16.xpose.msra.mxu1 %v111_v32 }
  0xf4   :  { %570 = vmatmul.mubr.msk.bf16.vlgmr.msra.gmra.mrb[0].mxu0 %vm70_vm0, %v101_v23  ;;  %574 = vmatmul.mubr.msk.bf16.vlgmr.msra.gmra.mrb[0].mxu1 %vm70_vm0, %v102_v27 }
  0xf5   :  { %577 = vmatprep.mubr.msk.bf16.mxu1 %vm748_vm1, %v747_v12 }
  0xfc   :  { %578 = vmatmul.mubr.msk.bf16.gmra.mrb[4].mxu1 %vm70_vm0, %v103_v31 }
 0x1c7   :  { %v850_v33 = vpop.f32.mrb[0].mxu0  ;;  %v852_v34 = vpop.f32.mrb[0].mxu1 }
 0x1c8   :  { %v571_v35 = vpop.f32.mrb[1].mxu0  ;;  %v575_v36 = vpop.f32.mrb[1].mxu1 }
 0x1c9   :  { %v854_v37 = vpop.f32.mrb[2].mxu0  ;;  %v856_v38 = vpop.f32.mrb[2].mxu1 }
 0x1ca   :  { %v572_v39 = vpop.f32.mrb[3].mxu0  ;;  %v576_v40 = vpop.f32.mrb[3].mxu1 }
 0x1cf   :  { %v858_v41 = vpop.f32.mrb[4].mxu1 }
 0x1d0   :  { %265 = vrot.lane.b32.xlu0 %v858_v41, %s743_s28  ;;  %v579_v42 = vpop.f32.mrb[5].mxu1  ;;  %v277_v43 = vsel %vm276_vm2, %v858_v41, -inf  ;;  %s750_s28 = smov 88  }
 0x1d1   :  { %278 = vmax.xlane.f32.xlu1 %v277_v43  ;;  %v356_v44 = vrot.slane %v277_v43, 4  ;;  %v864_v45 = vpop.f32.mrb[6].mxu1 }
 0x1d2   :  { %v580_v46 = vpop.f32.mrb[7].mxu1  ;;  %v283_v3 = vsel %vm276_vm2, %v864_v45, -inf }
 0x1d3   :  { %v357_v47 = vmax.f32 %v277_v43, %v356_v44  ;;  %v368_v35 = vrot.slane %v283_v3, 4 }
 0x1d5   :  { %v358_v48 = vrot.slane %v357_v47, 2 }
 0x1d7   :  { %v359_v49 = vmax.f32 %v357_v47, %v358_v48 }
 0x1d9   :  { %v360_v50 = vrot.slane %v359_v49, 1 }
 0x1db   :  { %v361_v51 = vmax.f32 %v359_v49, %v360_v50 }
 0x1dd   :  { %v374_v52 = vsub.f32 %v858_v41, %v361_v51 }
 0x1df   :  { %v377_v53 = vmul.f32 1.442695, %v374_v52 }
 0x1e1   :  { %628 = vpow2.f32 %v377_v53 }
 0x1eb   :  { %v629_v54 = vpop.eup %628 }
 0x1ec   :  { %v383_v55 = vsel %vm276_vm2, %v629_v54, 0.0 }
 0x1ed   :  { %v384_v56 = vrot.slane %v383_v55, 4 }
 0x1ef   :  { %v385_v57 = vadd.f32 %v384_v56, %v383_v55 }
 0x1f1   :  { %v386_v58 = vrot.slane %v385_v57, 2 }
 0x1f3   :  { %v387_v59 = vadd.f32 %v386_v58, %v385_v57 }
 0x1f5   :  { %v388_v60 = vrot.slane %v387_v59, 1 }
 0x1f7   :  { %v389_v61 = vadd.f32 %v388_v60, %v387_v59 }
 0x1f9   :  { %630 = vlog2.f32 %v389_v61 }
 0x203   :  { %v631_v62 = vpop.eup %630 }
 0x204   :  { %v405_v63 = vmul.f32 0.6931472, %v631_v62 }
 0x206   :  { %v868_v0 = vadd.f32 %v405_v63, %v361_v51 }
 0x242   :  { %v870_v1 = vpop.permute.xlu0 %265 }
 0x243   :  { %v280_v2 = vsel %vm276_vm2, %v870_v1, -inf }
 0x244   :  { %281 = vmax.xlane.f32.xlu1 %v280_v2  ;;  %v362_v31 = vrot.slane %v280_v2, 4 }
 0x246   :  { %v363_v32 = vmax.f32 %v280_v2, %v362_v31 }
 0x248   :  { %284 = vmax.xlane.f32.xlu1 %v283_v3  ;;  %v364_v36 = vrot.slane %v363_v32, 2 }
 0x24a   :  { %v365_v39 = vmax.f32 %v363_v32, %v364_v36 }
 0x24c   :  { %v366_v42 = vrot.slane %v365_v39, 1 }
 0x24e   :  { %v908_v12 = vmax.f32 %v365_v39, %v366_v42 }
 0x259   :  { %326 = vrot.lane.b32.xlu1 %v555_v8, %s749_s3 }
 0x25e   :  { %v878_v9 = vpop.xlane.xlu1 %278 }
 0x25f   :  { %v286_v10 = vsub.f32 %v858_v41, %v878_v9 }
 0x261   :  { %v289_v11 = vmul.f32 1.442695, %v286_v10 }
 0x263   :  { %632 = vpow2.f32 %v289_v11 }
 0x26d   :  { %v633_v13 = vpop.eup %632 }
 0x26e   :  { %298 = vrot.lane.b32.xlu0 %v633_v13, %s750_s28 }
 0x2d1   :  { %v883_v14 = vpop.xlane.xlu1 %281 }
 0x2d2   :  { %v287_v15 = vsub.f32 %v870_v1, %v883_v14 }
 0x2d4   :  { %v291_v16 = vmul.f32 1.442695, %v287_v15 }
 0x2d5   :  { %v887_v17 = vpop.xlane.xlu1 %284 }
 0x2d6   :  { %634 = vpow2.f32 %v291_v16  ;;  %v288_v18 = vsub.f32 %v864_v45, %v887_v17 }
 0x2d8   :  { %v293_v19 = vmul.f32 1.442695, %v288_v18 }
 0x2d9   :  { %v327_v22 = vpop.permute.xlu1 %326 }
 0x2da   :  { %636 = vpow2.f32 %v293_v19  ;;  %v329_v23 = vmul.f32 %v327_v22, %v858_v41  ;;  %v330_v26 = vmul.f32 %v327_v22, %v870_v1  ;;  %v331_v27 = vmul.f32 %v327_v22, %v864_v45 }
 0x2e0   :  { %v635_v20 = vpop.eup %634  ;;  %v299_v29 = vpop.permute.xlu0 %298 }
 0x2e1   :  { %300 = vrot.lane.b32.xlu0 %v635_v20, %s750_s28  ;;  %v307_v30 = vsel %vm183_vm6, %v299_v29, 0.0 }
 0x2e4   :  { %v637_v21 = vpop.eup %636 }
 0x2e5   :  { %218 = vrot.lane.b32.xlu0 %v856_v38, %s751_s29  ;;  %302 = vrot.lane.b32.xlu1 %v637_v21, %s750_s28  ;;  %v369_v38 = vmax.f32 %v283_v3, %v368_v35 }
 0x2e7   :  { %v370_v40 = vrot.slane %v369_v38, 2 }
 0x2e9   :  { %222 = vrot.lane.b32.xlu1 %v896_v25, %s752_s30  ;;  %335 = vrot.lane.b32.xlu0 %v329_v23, %s750_s28  ;;  %v371_v43 = vmax.f32 %v369_v38, %v370_v40 }
 0x2eb   :  { %v372_v44 = vrot.slane %v371_v43, 1 }
 0x2ed   :  { %337 = vrot.lane.b32.xlu1 %v330_v26, %s750_s28  ;;  %339 = vrot.lane.b32.xlu0 %v331_v27, %s750_s28  ;;  %v912_v46 = vmax.f32 %v371_v43, %v372_v44 }
 0x2ef   :  { %v376_v48 = vsub.f32 %v864_v45, %v912_v46 }
 0x2f1   :  { %414 = vrot.lane.b32.xlu1 %v556_v28, %s749_s3  ;;  %178 = vrot.lane.b32.xlu0 %v854_v37, %s751_s29  ;;  %v375_v37 = vsub.f32 %v870_v1, %v908_v12  ;;  %v381_v49 = vmul.f32 1.442695, %v376_v48 }
 0x2f3   :  { %v379_v47 = vmul.f32 1.442695, %v375_v37 }
 0x2f5   :  { %638 = vpow2.f32 %v379_v47  ;;  %v181_v47 = vmul.f32 %v896_v25, %v850_v33 }
 0x2f6   :  { %640 = vpow2.f32 %v381_v49 }
 0x2ff   :  { %v639_v50 = vpop.eup %638 }
 0x300   :  { %v390_v51 = vsel %vm276_vm2, %v639_v50, 0.0  ;;  %v641_v52 = vpop.eup %640 }
 0x301   :  { %v391_v53 = vrot.slane %v390_v51, 4  ;;  %v397_v54 = vsel %vm276_vm2, %v641_v52, 0.0 }
 0x302   :  { %v398_v56 = vrot.slane %v397_v54, 4 }
 0x303   :  { %v392_v55 = vadd.f32 %v391_v53, %v390_v51 }
 0x304   :  { %v399_v59 = vadd.f32 %v398_v56, %v397_v54  ;;  %v184_v56 = vsel %vm183_vm6, %v181_v47, 0.0 }
 0x305   :  { %v393_v58 = vrot.slane %v392_v55, 2 }
 0x306   :  { %v400_v63 = vrot.slane %v399_v59, 2 }
 0x307   :  { %v394_v62 = vadd.f32 %v393_v58, %v392_v55 }
 0x308   :  { %v401_v6 = vadd.f32 %v400_v63, %v399_v59 }
 0x309   :  { %v395_v5 = vrot.slane %v394_v62, 1 }
 0x30a   :  { %v402_v20 = vrot.slane %v401_v6, 1 }
 0x30b   :  { %v396_v19 = vadd.f32 %v395_v5, %v394_v62 }
 0x30c   :  { %v403_v27 = vadd.f32 %v402_v20, %v401_v6 }
 0x30d   :  { %642 = vlog2.f32 %v396_v19 }
 0x30e   :  { %644 = vlog2.f32 %v403_v27 }
 0x310   :  { %308 = vadd.xlane.f32.xlu0 %v307_v30 }
 0x317   :  { %v643_v55 = vpop.eup %642 }
 0x318   :  { %v645_v63 = vpop.eup %644 }
 0x353   :  { %v301_v57 = vpop.permute.xlu0 %300 }
 0x354   :  { %v310_v37 = vsel %vm183_vm6, %v301_v57, 0.0 }
 0x357   :  { %v219_v60 = vpop.permute.xlu0 %218  ;;  %v303_v61 = vpop.permute.xlu1 %302 }
 0x358   :  { %v313_v2 = vsel %vm183_vm6, %v303_v61, 0.0 }
 0x359   :  { %314 = vadd.xlane.f32.xlu0 %v313_v2 }
 0x35b   :  { %v336_v3 = vpop.permute.xlu0 %335  ;;  %v223_v4 = vpop.permute.xlu1 %222 }
 0x35c   :  { %v225_v7 = vmul.f32 %v223_v4, %v852_v34  ;;  %v226_v8 = vmul.f32 %v223_v4, %v219_v60  ;;  %v344_v10 = vsel %vm183_vm6, %v336_v3, 0.0 }
 0x35d   :  { %345 = vadd.xlane.f32.xlu1 %v344_v10  ;;  %v409_v10 = vmul.f32 0.6931472, %v645_v63 }
 0x35e   :  { %v228_v11 = vsel %vm227_vm7, %v225_v7, 0.0  ;;  %v229_v13 = vsel %vm227_vm7, %v226_v8, 0.0 }
 0x35f   :  { %v230_v15 = vadd.f32 %v229_v13, %v228_v11  ;;  %v340_v16 = vpop.permute.xlu0 %339  ;;  %v338_v18 = vpop.permute.xlu1 %337 }
 0x360   :  { %v347_v21 = vsel %vm183_vm6, %v338_v18, 0.0  ;;  %v350_v31 = vsel %vm183_vm6, %v340_v16, 0.0 }
 0x361   :  { %v231_v22 = vmul.f32 0.5, %v230_v15  ;;  %348 = vadd.xlane.f32.xlu1 %v347_v21 }
 0x363   :  { %v232_v23 = vsub.f32 %v225_v7, %v231_v22  ;;  %v233_v24 = vsub.f32 %v226_v8, %v231_v22  ;;  %v415_v34 = vpop.permute.xlu1 %414  ;;  %v179_v26 = vpop.permute.xlu0 %178 }
 0x364   :  { %v417_v28 = vmul.f32 %v415_v34, %v858_v41  ;;  %v418_v29 = vmul.f32 %v415_v34, %v870_v1  ;;  %v419_v30 = vmul.f32 %v415_v34, %v864_v45  ;;  %v182_v40 = vmul.f32 %v896_v25, %v179_v26 }
 0x365   :  { %v234_v32 = vmul.f32 %v232_v23, %v232_v23  ;;  %v235_v35 = vmul.f32 %v233_v24, %v233_v24  ;;  %351 = vadd.xlane.f32.xlu1 %v350_v31  ;;  %v407_v25 = vmul.f32 0.6931472, %v643_v55 }
 0x366   :  { %v420_v36 = vsel %vm276_vm2, %v417_v28, 0.0  ;;  %v427_v38 = vsel %vm276_vm2, %v418_v29, 0.0  ;;  %v434_v39 = vsel %vm276_vm2, %v419_v30, 0.0  ;;  %v185_v53 = vsel %vm183_vm6, %v182_v40, 0.0 }
 0x367   :  { %v236_v42 = vsel %vm227_vm7, %v234_v32, 0.0  ;;  %v237_v41 = vsel %vm227_vm7, %v235_v35, 0.0  ;;  %v421_v1 = vrot.slane %v420_v36, 4  ;;  %v428_v43 = vrot.slane %v427_v38, 4 }
 0x368   :  { %v238_v45 = vadd.f32 %v237_v41, %v236_v42  ;;  %v435_v44 = vrot.slane %v434_v39, 4  ;;  %v186_v57 = vadd.f32 %v185_v53, %v184_v56  ;;  %v411_v7 = vadd.f32 %v407_v25, %v908_v12 }
 0x369   :  { %v422_v48 = vadd.f32 %v421_v1, %v420_v36  ;;  %v429_v49 = vadd.f32 %v428_v43, %v427_v38  ;;  %311 = vadd.xlane.f32.xlu1 %v310_v37 }
 0x36a   :  { %v436_v50 = vadd.f32 %v435_v44, %v434_v39  ;;  %646 = vrsqrt.f32 %v238_v45  ;;  %v188_v2 = vmul.f32 0.5, %v186_v57  ;;  %vm241_vm8 = vcmp.eq.f32.partialorder %v238_v45, inf }
 0x36b   :  { %v423_v51 = vrot.slane %v422_v48, 2  ;;  %v430_v52 = vrot.slane %v429_v49, 2  ;;  %vm243_vm9 = vcmp.eq.f32.partialorder %v238_v45, 0.0  ;;  %v244_v13 = vand.u32 2147483648, %v238_v45 }
 0x36c   :  { %v437_v54 = vrot.slane %v436_v50, 2  ;;  %v189_v11 = vsub.f32 %v181_v47, %v188_v2  ;;  %v190_v15 = vsub.f32 %v182_v40, %v188_v2 }
 0x36d   :  { %v424_v58 = vadd.f32 %v423_v51, %v422_v48  ;;  %v431_v59 = vadd.f32 %v430_v52, %v429_v49 }
 0x36e   :  { %v438_v62 = vadd.f32 %v437_v54, %v436_v50  ;;  %v191_v21 = vmul.f32 %v189_v11, %v189_v11  ;;  %v192_v22 = vmul.f32 %v190_v15, %v190_v15 }
 0x36f   :  { %v425_v60 = vrot.slane %v424_v58, 1  ;;  %v432_v61 = vrot.slane %v431_v59, 1 }
 0x370   :  { %v439_v5 = vrot.slane %v438_v62, 1  ;;  %v193_v23 = vsel %vm183_vm6, %v191_v21, 0.0  ;;  %v194_v24 = vsel %vm183_vm6, %v192_v22, 0.0 }
 0x371   :  { %v426_v33 = vadd.f32 %v425_v60, %v424_v58  ;;  %v433_v4 = vadd.f32 %v432_v61, %v431_v59  ;;  %v195_v34 = vadd.f32 %v194_v24, %v193_v23 }
 0x372   :  { %v440_v19 = vadd.f32 %v439_v5, %v438_v62 }
 0x373   :  { %v441_v3 = vsub.f32 %v868_v0, %v426_v33  ;;  %v442_v16 = vsub.f32 %v411_v7, %v433_v4  ;;  %v412_v0 = vadd.f32 %v409_v10, %v912_v46  ;;  %648 = vrsqrt.f32 %v195_v34 }
 0x374   :  { %v647_v6 = vpop.eup %646  ;;  %vm198_vm10 = vcmp.eq.f32.partialorder %v195_v34, inf  ;;  %v201_v29 = vand.u32 2147483648, %v195_v34  ;;  %vm200_vm11 = vcmp.eq.f32.partialorder %v195_v34, 0.0 }
 0x375   :  { %456 = vrot.lane.b32.xlu0 %v441_v3, %s750_s28  ;;  %v240_v8 = vmul.f32 %v647_v6, %v238_v45  ;;  %v443_v12 = vsub.f32 %v412_v0, %v440_v19 }
 0x377   :  { %v242_v18 = vsel %vm241_vm8, %v238_v45, %v240_v8 }
 0x378   :  { %v245_v20 = vsel %vm243_vm9, %v244_v13, %v242_v18 }
 0x379   :  { %483 = vrot.lane.b32.xlu0 %v442_v16, %s750_s28 }
 0x37a   :  { %247 = vrot.lane.b32.xlu1 %v245_v20, %s753_s5 }
 0x37d   :  { %509 = vrot.lane.b32.xlu0 %v443_v12, %s750_s28  ;;  %v649_v26 = vpop.eup %648 }
 0x37e   :  { %v197_v27 = vmul.f32 %v649_v26, %v195_v34 }
 0x380   :  { %v199_v28 = vsel %vm198_vm10, %v195_v34, %v197_v27 }
 0x381   :  { %v202_v46 = vsel %vm200_vm11, %v201_v29, %v199_v28 }
 0x382   :  { %v203_v30 = vsel %vm183_vm6, %v202_v46, 0.0 }
 0x39d   :  { %v309_v32 = vpop.xlane.xlu0 %308 }
 0x39e   :  { %204 = vadd.xlane.f32.xlu1 %v203_v30  ;;  %650 = vlog2.f32 %v309_v32 }
 0x3a8   :  { %v651_v40 = vpop.eup %650 }
 0x3a9   :  { %v317_v45 = vmul.f32 0.6931472, %v651_v40 }
 0x3ab   :  { %v322_v49 = vadd.f32 %v317_v45, %v878_v9 }
 0x3e6   :  { %v315_v36 = vpop.xlane.xlu0 %314 }
 0x3e7   :  { %652 = vlog2.f32 %v315_v36 }
 0x3ea   :  { %v346_v31 = vpop.xlane.xlu1 %345  ;;  %v457_v42 = vpop.permute.xlu0 %456 }
 0x3eb   :  { %v460_v44 = vsel %vm459_vm12, %v457_v42, 0.0  ;;  %v353_v51 = vsub.f32 %v322_v49, %v346_v31 }
 0x3ed   :  { %v445_v56 = vsel %vm444_vm13, %v353_v51, 0.0 }
 0x3ee   :  { %v349_v35 = vpop.xlane.xlu1 %348  ;;  %v484_v47 = vpop.permute.xlu0 %483 }
 0x3ef   :  { %v486_v52 = vsel %vm459_vm12, %v484_v47, 0.0 }
 0x3f1   :  { %v653_v43 = vpop.eup %652 }
 0x3f2   :  { %v352_v38 = vpop.xlane.xlu1 %351  ;;  %v321_v37 = vmul.f32 0.6931472, %v653_v43  ;;  %v510_v59 = vpop.permute.xlu0 %509 }
 0x3f3   :  { %v512_v60 = vsel %vm459_vm12, %v510_v59, 0.0 }
 0x3f4   :  { %v324_v53 = vadd.f32 %v321_v37, %v887_v17 }
 0x3f6   :  { %v312_v39 = vpop.xlane.xlu1 %311  ;;  %v355_v58 = vsub.f32 %v324_v53, %v352_v38 }
 0x3f7   :  { %654 = vlog2.f32 %v312_v39 }
 0x3f8   :  { %v498_v9 = vsel %vm444_vm13, %v355_v58, 0.0 }
 0x3fa   :  { %v248_v41 = vpop.permute.xlu1 %247 }
 0x3fb   :  { %v250_v1 = vsel %vm183_vm6, %v248_v41, 0.0 }
 0x3fc   :  { %251 = vadd.xlane.f32.xlu0 %v250_v1 }
 0x400   :  { %461 = vadd.xlane.f32.xlu0 %v460_v44 }
 0x401   :  { %v655_v48 = vpop.eup %654 }
 0x402   :  { %v319_v50 = vmul.f32 0.6931472, %v655_v48 }
 0x404   :  { %487 = vadd.xlane.f32.xlu0 %v486_v52  ;;  %v323_v54 = vadd.f32 %v319_v50, %v883_v14 }
 0x406   :  { %v354_v55 = vsub.f32 %v323_v54, %v349_v35 }
 0x408   :  { %446 = vadd.xlane.f32.xlu0 %v445_v56  ;;  %v472_v57 = vsel %vm444_vm13, %v354_v55, 0.0 }
 0x409   :  { %473 = vadd.xlane.f32.xlu1 %v472_v57 }
 0x40c   :  { %513 = vadd.xlane.f32.xlu0 %v512_v60 }
 0x40d   :  { %499 = vadd.xlane.f32.xlu1 %v498_v9 }
 0x42b   :  { %v205_v61 = vpop.xlane.xlu1 %204 }
 0x42c   :  { %v206_v62 = vrot.slane %v205_v61, 4 }
 0x42e   :  { %v207_v33 = vadd.f32 %v206_v62, %v205_v61 }
 0x430   :  { %v208_v17 = vrot.slane %v207_v33, 2 }
 0x432   :  { %v209_v25 = vadd.f32 %v208_v17, %v207_v33 }
 0x434   :  { %v210_v63 = vrot.slane %v209_v25, 1 }
 0x436   :  { %v211_v2 = vadd.f32 %v210_v63, %v209_v25 }
 0x438   :  { %587 = vpush %v211_v2 }
 0x469   :  { %s588_s6 = spop %587 }
 0x46a   :  { %s215_s7 = smul.f32 0.015625, %s588_s6 }
 0x46c   :  { %s216_s8 = smul.f32 156.25, %s215_s7 }
 0x46e   :  { %525 = sst [smem:[#allocation8]] %s216_s8 }
 0x489   :  { %v252_v14 = vpop.xlane.xlu0 %251 }
 0x48a   :  { %v253_v3 = vrot.slane %v252_v14, 4 }
 0x48c   :  { %v254_v4 = vadd.f32 %v253_v3, %v252_v14 }
 0x48d   :  { %v462_v5 = vpop.xlane.xlu0 %461 }
 0x48e   :  { %v255_v6 = vrot.slane %v254_v4, 2  ;;  %v463_v7 = vrot.slane %v462_v5, 4 }
 0x490   :  { %v256_v8 = vadd.f32 %v255_v6, %v254_v4  ;;  %v464_v10 = vadd.f32 %v463_v7, %v462_v5 }
 0x491   :  { %v488_v11 = vpop.xlane.xlu0 %487 }
 0x492   :  { %v489_v13 = vrot.slane %v488_v11, 4  ;;  %v257_v15 = vrot.slane %v256_v8, 1  ;;  %v465_v19 = vrot.slane %v464_v10, 2 }
 0x494   :  { %v490_v16 = vadd.f32 %v489_v13, %v488_v11  ;;  %v258_v18 = vadd.f32 %v257_v15, %v256_v8  ;;  %v466_v26 = vadd.f32 %v465_v19, %v464_v10 }
 0x495   :  { %v447_v20 = vpop.xlane.xlu0 %446 }
 0x496   :  { %v448_v0 = vrot.slane %v447_v20, 4  ;;  %v474_v21 = vpop.xlane.xlu1 %473  ;;  %589 = vpush %v258_v18  ;;  %v491_v22 = vrot.slane %v490_v16, 2  ;;  %v467_v38 = vrot.slane %v466_v26, 1 }
 0x497   :  { %v475_v12 = vrot.slane %v474_v21, 4 }
 0x498   :  { %v449_v23 = vadd.f32 %v448_v0, %v447_v20  ;;  %v492_v31 = vadd.f32 %v491_v22, %v490_v16  ;;  %v468_v47 = vadd.f32 %v467_v38, %v466_v26 }
 0x499   :  { %v476_v24 = vadd.f32 %v475_v12, %v474_v21  ;;  %v514_v34 = vpop.xlane.xlu0 %513 }
 0x49a   :  { %v450_v27 = vrot.slane %v449_v23, 2  ;;  %v515_v28 = vrot.slane %v514_v34, 4  ;;  %v500_v29 = vpop.xlane.xlu1 %499  ;;  %v493_v43 = vrot.slane %v492_v31, 1 }
 0x49b   :  { %v477_v46 = vrot.slane %v476_v24, 2  ;;  %v501_v30 = vrot.slane %v500_v29, 4 }
 0x49c   :  { %v516_v32 = vadd.f32 %v515_v28, %v514_v34  ;;  %v451_v35 = vadd.f32 %v450_v27, %v449_v23  ;;  %v494_v50 = vadd.f32 %v493_v43, %v492_v31 }
 0x49d   :  { %v502_v36 = vadd.f32 %v501_v30, %v500_v29  ;;  %v478_v39 = vadd.f32 %v477_v46, %v476_v24 }
 0x49e   :  { %v517_v40 = vrot.slane %v516_v32, 2  ;;  %v452_v42 = vrot.slane %v451_v35, 1 }
 0x49f   :  { %v503_v41 = vrot.slane %v502_v36, 2  ;;  %v479_v1 = vrot.slane %v478_v39, 1 }
 0x4a0   :  { %v518_v45 = vadd.f32 %v517_v40, %v516_v32  ;;  %v453_v44 = vadd.f32 %v452_v42, %v451_v35 }
 0x4a1   :  { %v504_v37 = vadd.f32 %v503_v41, %v502_v36  ;;  %v480_v48 = vadd.f32 %v479_v1, %v478_v39 }
 0x4a2   :  { %591 = vpush %v453_v44  ;;  %v519_v49 = vrot.slane %v518_v45, 1 }
 0x4a3   :  { %593 = vpush %v468_v47  ;;  %v505_v51 = vrot.slane %v504_v37, 1 }
 0x4a4   :  { %595 = vpush %v480_v48  ;;  %v520_v52 = vadd.f32 %v519_v49, %v518_v45 }
 0x4a5   :  { %597 = vpush %v494_v50  ;;  %v506_v53 = vadd.f32 %v505_v51, %v504_v37 }
 0x4a7   :  { %599 = vpush %v506_v53 }
 0x4a8   :  { %601 = vpush %v520_v52 }
 0x4c7   :  { %s590_s9 = spop %589 }
 0x4c8   :  { %s262_s10 = smul.f32 0.015625, %s590_s9 }
 0x4ca   :  { %s263_s11 = smul.f32 156.25, %s262_s10 }
 0x4cc   :  { %527 = sst [smem:[#allocation8 + $0x1]] %s263_s11 }
 0x4d3   :  { %s592_s12 = spop %591 }
 0x4d4   :  { %s594_s1 = spop %593 }
 0x4d5   :  { %s470_s13 = sadd.f32 %s594_s1, %s592_s12  ;;  %s596_s14 = spop %595 }
 0x4d6   :  { %s598_s15 = spop %597 }
 0x4d7   :  { %s471_s16 = smul.f32 0.0625, %s470_s13  ;;  %s496_s17 = sadd.f32 %s598_s15, %s596_s14 }
 0x4d8   :  { %s600_s19 = spop %599 }
 0x4d9   :  { %529 = sst [smem:[#allocation8 + $0x2]] %s471_s16  ;;  %s497_s20 = smul.f32 0.0625, %s496_s17 }
 0x4da   :  { %s602_s21 = spop %601 }
 0x4db   :  { %531 = sst [smem:[#allocation8 + $0x3]] %s497_s20 }
 0x4dc   :  { %s522_s0 = sadd.f32 %s602_s21, %s600_s19 }
 0x4de   :  { %s523_s18 = smul.f32 0.0625, %s522_s0 }
 0x4e0   :  { %533 = sst [smem:[#allocation8 + $0x4]] %s523_s18 }
 0x4e1   :  { %733 = shalt.err (!%p730_p0)
}
 0x4e2   :  { %s754_s26 = smov [#allocation8]  }
 0x4e3   :  { %543 = dma.smem_to_vmem %s754_s26, 16, %s541_s24, [#allocation4]  }
 0x4e4   :  { %738 = dma.done.wait [#allocation4], 16  }
 0x4e5   :  { %739 = vsyncadd [#allocation4], 4294967280 }
 0x4e6   :  { %547 = sfence }
 0x4e7   :  { %548 = vsyncpa [#allocation3], 1 }
 0x4e8   :  { %549 = vsyncpa [#allocation6], 1 }
 0x4e9   :  { %550 = vsyncpa [#allocation4], 1 }

</bundles_post_ra>
